<compile_context>
chip_gen: v7x
topology: tpu7x:2x2x1
jax: 0.10.0
libtpu: 0.0.40
codegen_flags: <defaults>
</compile_context>

<pallas_src>
import jax
import jax.numpy as jnp
from jax.experimental import pallas as pl
from jax.experimental.pallas import tpu as pltpu


def _round_up(x, m):
    return ((x + m - 1) // m) * m


# ---------------------------------------------------------------------------
# Resident-weight fast path: whole weight + bias live in VMEM, activation is
# streamed exactly once.  grid = (cdiv(M, tm),).
# ---------------------------------------------------------------------------
def _resident_kernel(x_ref, w_ref, b_ref, o_ref):
    # x_ref: (tm, K), w_ref: (K, N), b_ref: (1, N), o_ref: (tm, N) f32.
    o_ref[...] = (
        jnp.dot(x_ref[...], w_ref[...], preferred_element_type=jnp.float32)
        + b_ref[...]
    ).astype(o_ref.dtype)


def _linear_resident(x2d, w, b, *, compute_dtype):
    M, K = x2d.shape
    N = w.shape[1]
    itemsize = jnp.dtype(compute_dtype).itemsize

    xc = x2d.astype(compute_dtype)
    wc = w.astype(compute_dtype)
    bc = b.reshape(1, N).astype(jnp.float32)

    # Largest row tile (multiple of 8) whose double-buffered footprint fits a
    # conservative VMEM budget (safe on v7x's 64 MiB physical VMEM; scoped
    # limit raised explicitly below for v5e's 16 MiB default).
    budget = 20 * 1024 * 1024
    w_bytes = 2 * K * N * itemsize + 2 * N * 4
    tm = min(1024, _round_up(M, 8))
    while tm > 8 and (2 * tm * K * itemsize + 2 * tm * N * 4 + w_bytes) > budget:
        tm //= 2
    tm = max(8, tm)
    if tm >= M:
        tm = M  # single full-extent block (legal for any M)

    grid = (pl.cdiv(M, tm),)

    cost = pl.CostEstimate(
        flops=2 * M * K * N,
        transcendentals=0,
        bytes_accessed=M * K * itemsize + K * N * itemsize + N * 4 + M * N * 4,
    )

    return pl.pallas_call(
        _resident_kernel,
        out_shape=jax.ShapeDtypeStruct((M, N), jnp.float32),
        grid_spec=pltpu.PrefetchScalarGridSpec(
            num_scalar_prefetch=0,
            grid=grid,
            in_specs=[
                pl.BlockSpec((tm, K), lambda i: (i, 0)),   # activation row tile
                pl.BlockSpec((K, N), lambda i: (0, 0)),    # resident weight
                pl.BlockSpec((1, N), lambda i: (0, 0)),    # resident bias
            ],
            out_specs=pl.BlockSpec((tm, N), lambda i: (i, 0)),
        ),
        compiler_params=pltpu.CompilerParams(
            dimension_semantics=("parallel",),
            vmem_limit_bytes=32 * 1024 * 1024,
        ),
        cost_estimate=cost,
    )(xc, wc, bc)


# ---------------------------------------------------------------------------
# Blocked (i, j, k) fallback for weights too large to keep resident.
# The f32 output block is invariant across k, so it stays VMEM-resident and
# doubles as the accumulator (no scratch, bias folded into the k == 0 init).
# ---------------------------------------------------------------------------
def _blocked_kernel(x_ref, w_ref, b_ref, o_ref):
    @pl.when(pl.program_id(2) == 0)
    def _init():
        o_ref[...] = jnp.broadcast_to(b_ref[...], o_ref.shape)

    o_ref[...] += jnp.dot(
        x_ref[...], w_ref[...], preferred_element_type=jnp.float32
    )


def _linear_blocked(x2d, w, b, *, compute_dtype, tm=512, tn=512, tk=512):
    M, K = x2d.shape
    N = w.shape[1]
    itemsize = jnp.dtype(compute_dtype).itemsize

    tm = min(tm, _round_up(M, 8))
    if tm > M:
        tm = M                      # full-extent block: legal for any M
    tn = min(tn, _round_up(N, 128))
    if tn > N:
        tn = N                      # full-extent block: legal for any N
    tk = min(tk, _round_up(K, 128))

    xc = x2d.astype(compute_dtype)
    wc = w.astype(compute_dtype)
    bc = b.reshape(1, N).astype(jnp.float32)

    # Only the reduction axis needs exact zero padding (garbage there would
    # pollute valid outputs); ragged M / N use partial trailing blocks.
    K_pad = _round_up(K, tk)
    if K_pad != K:
        xc = jnp.pad(xc, ((0, 0), (0, K_pad - K)))
        wc = jnp.pad(wc, ((0, K_pad - K), (0, 0)))

    grid = (pl.cdiv(M, tm), pl.cdiv(N, tn), K_pad // tk)

    cost = pl.CostEstimate(
        flops=2 * M * K_pad * N,
        transcendentals=0,
        bytes_accessed=(M * K_pad * itemsize * grid[1]
                        + K_pad * N * itemsize * grid[0]
                        + N * 4 + M * N * 4),
    )

    return pl.pallas_call(
        _blocked_kernel,
        out_shape=jax.ShapeDtypeStruct((M, N), jnp.float32),
        grid_spec=pltpu.PrefetchScalarGridSpec(
            num_scalar_prefetch=0,
            grid=grid,
            in_specs=[
                pl.BlockSpec((tm, tk), lambda i, j, k: (i, k)),
                pl.BlockSpec((tk, tn), lambda i, j, k: (k, j)),
                pl.BlockSpec((1, tn), lambda i, j, k: (0, j)),
            ],
            out_specs=pl.BlockSpec((tm, tn), lambda i, j, k: (i, j)),
        ),
        compiler_params=pltpu.CompilerParams(
            dimension_semantics=("parallel", "parallel", "arbitrary"),
            vmem_limit_bytes=32 * 1024 * 1024,
        ),
        cost_estimate=cost,
    )(xc, wc, bc)


# ---------------------------------------------------------------------------
# Dispatcher + TimeDistributed wrapper.
# ---------------------------------------------------------------------------
def linear_pallas(x2d, w, b, *, compute_dtype=jnp.bfloat16):
    """y = x2d @ w + b, returned in float32 (accumulation always in f32)."""
    M, K = x2d.shape
    Kw, N = w.shape
    assert K == Kw, "weight in_features must match input feature dim"

    # Tiny problems: Pallas per-step overhead + alignment padding dominate;
    # XLA's fused dot is strictly faster on all generations.
    if M < 8 or (M * K * N) < (1 << 18):
        return (x2d.astype(jnp.float32) @ w.astype(jnp.float32)
                + b.astype(jnp.float32))

    itemsize = jnp.dtype(compute_dtype).itemsize
    # Resident-weight fast path when the (double-buffered) weight fits a few
    # MiB of VMEM -- always the case for TimeDistributed(nn.Linear).
    if 2 * K * N * itemsize <= 8 * 1024 * 1024:
        return _linear_resident(x2d, w, b, compute_dtype=compute_dtype)
    return _linear_blocked(x2d, w, b, compute_dtype=compute_dtype)


def time_distributed_linear(x, w, b, *, compute_dtype=jnp.bfloat16):
    """JAX/Pallas equivalent of TimeDistributed(nn.Linear(K, N)).forward(x)."""
    K = w.shape[0]
    N_out = w.shape[1]

    if x.ndim <= 2:
        if x.ndim == 1:
            y = linear_pallas(x.reshape(1, K), w, b, compute_dtype=compute_dtype)
            return y.reshape(N_out)
        return linear_pallas(x, w, b, compute_dtype=compute_dtype)

    t, n = x.shape[0], x.shape[1]
    rest = x.shape[2:]               # (..., K); Linear acts on the last dim.
    lead = 1
    for d in rest[:-1]:
        lead *= d
    x2d = x.reshape(t * n * lead, rest[-1])
    y = linear_pallas(x2d, w, b, compute_dtype=compute_dtype)   # already f32
    return y.reshape((t, n) + rest[:-1] + (N_out,))


if __name__ == "__main__":
    key = jax.random.PRNGKey(0)
    kx, kw, kb, kx2 = jax.random.split(key, 4)

    # Shapes implied by TimeDistributed(nn.Linear): (seq, batch, features).
    T, B, F_IN, F_OUT = 8, 2, 32, 64
    w = jax.random.normal(kw, (F_IN, F_OUT), dtype=jnp.float32) * 0.05
    b = jax.random.normal(kb, (F_OUT,), dtype=jnp.float32) * 0.05

    # 1) Module-sized input -> tiny-problem fallback path (exact f32).
    x_small = jax.random.normal(kx, (T, B, F_IN), dtype=jnp.float32)
    y_small = jax.block_until_ready(time_distributed_linear(x_small, w, b))
    ref_small = (x_small.reshape(T * B, F_IN) @ w + b).reshape(T, B, F_OUT)
    assert y_small.shape == (T, B, F_OUT)
    assert y_small.dtype == jnp.float32
    assert jnp.allclose(y_small, ref_small, atol=1e-5, rtol=1e-5)

    # 2) Larger fold -> Pallas resident-weight kernel, f32 compute (exact).
    T2, B2 = 16, 16
    x_big = jax.random.normal(kx2, (T2, B2, F_IN), dtype=jnp.float32)
    ref_big = (x_big.reshape(T2 * B2, F_IN) @ w + b).reshape(T2, B2, F_OUT)
    y_f32 = jax.block_until_ready(
        time_distributed_linear(x_big, w, b, compute_dtype=jnp.float32))
    assert jnp.allclose(y_f32, ref_big, atol=1e-5, rtol=1e-5)

    # 3) Same problem through the default bf16 compute path (f32 accumulate).
    y_bf16 = jax.block_until_ready(time_distributed_linear(x_big, w, b))
    assert y_bf16.dtype == jnp.float32
    assert jnp.allclose(y_bf16, ref_big, atol=2e-2, rtol=2e-2)

    # 4) Ragged M (not a multiple of the row tile): exercises the cdiv grid
    #    with a partial trailing block -- no jnp.pad copy of the activation.
    T3, B3 = 10, 103                      # M = 1030 rows, tm = 1024
    x_rag = jax.random.normal(kx, (T3, B3, F_IN), dtype=jnp.float32)
    y_rag = jax.block_until_ready(
        time_distributed_linear(x_rag, w, b, compute_dtype=jnp.float32))
    ref_rag = (x_rag.reshape(T3 * B3, F_IN) @ w + b).reshape(T3, B3, F_OUT)
    assert jnp.allclose(y_rag, ref_rag, atol=1e-5, rtol=1e-5)

    # 5) ndim <= 2 branch (PyTorch applies the wrapped module directly).
    y1d = jax.block_until_ready(
        time_distributed_linear(x_small[0, 0], w, b, compute_dtype=jnp.float32))
    assert jnp.allclose(y1d, x_small[0, 0] @ w + b, atol=1e-5, rtol=1e-5)

    print("KERNEL_OK")
</pallas_src>

<mosaic_0001>
module attributes {stable_mosaic.version = 11 : i64} {
  func.func @_resident_kernel(%arg0: i32, %arg1: memref<256x32xf32, #tpu.memory_space<vmem>>, %arg2: memref<32x64xf32, #tpu.memory_space<vmem>>, %arg3: memref<1x64xf32, #tpu.memory_space<vmem>>, %arg4: memref<256x64xf32, #tpu.memory_space<vmem>>) attributes {dimension_semantics = [#tpu.dimension_semantics<parallel>], iteration_bounds = array<i64: 1>, scalar_prefetch = 0 : i64, scratch_operands = 0 : i64, tpu.core_type = #tpu.core_type<tc>, window_params = [{transform_indices = @transform_0, window_bounds = array<i64: 256, 32>}, {pipeline_mode = #tpu.pipeline_mode<synchronous>, transform_indices = @transform_1, window_bounds = array<i64: 32, 64>}, {pipeline_mode = #tpu.pipeline_mode<synchronous>, transform_indices = @transform_2, window_bounds = array<i64: 1, 64>}, {transform_indices = @transform_3, window_bounds = array<i64: 256, 64>}]} {
    %c0 = arith.constant 0 : index
    %c0_0 = arith.constant 0 : index
    %0 = vector.load %arg1[%c0, %c0_0] : memref<256x32xf32, #tpu.memory_space<vmem>>, vector<256x32xf32>
    %c0_1 = arith.constant 0 : index
    %c0_2 = arith.constant 0 : index
    %1 = vector.load %arg2[%c0_1, %c0_2] : memref<32x64xf32, #tpu.memory_space<vmem>>, vector<32x64xf32>
    %cst = arith.constant dense<0.000000e+00> : vector<256x64xf32>
    %2 = tpu.matmul %0, %1, %cst {dimension_numbers = #tpu.dot_dimension_numbers<[1], [0], [0], [1], [0, 0, 1, 1], [], []>} : vector<256x32xf32>, vector<32x64xf32>, vector<256x64xf32> -> vector<256x64xf32>
    %c0_3 = arith.constant 0 : index
    %c0_4 = arith.constant 0 : index
    %3 = vector.load %arg3[%c0_3, %c0_4] : memref<1x64xf32, #tpu.memory_space<vmem>>, vector<1x64xf32>
    %4 = vector.broadcast %3 : vector<1x64xf32> to vector<256x64xf32>
    %5 = arith.addf %2, %4 : vector<256x64xf32>
    %c0_5 = arith.constant 0 : index
    %c0_6 = arith.constant 0 : index
    %6 = vector.load %arg4[%c0_5, %c0_6] : memref<256x64xf32, #tpu.memory_space<vmem>>, vector<256x64xf32>
    tpu.vector_store %arg4[%c0_5, %c0_6], %5 {strides = array<i32>} : memref<256x64xf32, #tpu.memory_space<vmem>>, vector<256x64xf32>,
    return
  }
  func.func @transform_0(%arg0: i32) -> (i32, i32) {
    %c0_i32 = arith.constant 0 : i32
    %c0_i32_0 = arith.constant 0 : i32
    return %arg0, %c0_i32 : i32, i32
  }
  func.func @transform_1(%arg0: i32) -> (i32, i32) {
    %c0_i32 = arith.constant 0 : i32
    %c0_i32_0 = arith.constant 0 : i32
    %c0_i32_1 = arith.constant 0 : i32
    return %c0_i32, %c0_i32_0 : i32, i32
  }
  func.func @transform_2(%arg0: i32) -> (i32, i32) {
    %c0_i32 = arith.constant 0 : i32
    %c0_i32_0 = arith.constant 0 : i32
    %c0_i32_1 = arith.constant 0 : i32
    return %c0_i32, %c0_i32_0 : i32, i32
  }
  func.func @transform_3(%arg0: i32) -> (i32, i32) {
    %c0_i32 = arith.constant 0 : i32
    %c0_i32_0 = arith.constant 0 : i32
    return %arg0, %c0_i32 : i32, i32
  }
}

</mosaic_0001>

<bundles_post_ra>
// kernel: tpu_custom_call.1
= control target key start
LH: loop header
LB: loop body
LE: loop exit
PB: predicated region body
PF: predicated region fallthrough
CT: control target
= control target key end

     0   :  { %vm57_vm0 = vcmask 261120   ;;  %vm379_vm1 = vcmask 523264   ;;  %s878_s1 = inlined_call_operand.vmem [shape: f32[32,64], index: 1, kind: input, shape index: {}]   ;;  %s879_s0 = inlined_call_operand.vmem [shape: f32[256,32], index: 0, kind: input, shape index: {}]   ;;  %s880_s2 = inlined_call_operand.vmem [shape: f32[1,64], index: 2, kind: input, shape index: {}]   ;;  %s881_s3 = inlined_call_operand.vmem [shape: f32[256,64], index: 3, kind: output, shape index: {}]  }
   0x1   :  { %v46_v0 = vld [vmem:[%s878_s1] sm:$0xff]  ;;  %v47_v1 = vld [vmem:[%s878_s1 + $0x8] sm:$0xff]  ;;  %v48_v2 = vld [vmem:[%s878_s1 + $0x10] sm:$0xff] }
   0x2   :  { %v541_v3 = vpack.c.bf16 %v47_v1, %v46_v0  ;;  %v49_v4 = vld [vmem:[%s878_s1 + $0x18] sm:$0xff]  ;;  %v14_v5 = vld [vmem:[%s879_s0] sm:$0xff]  ;;  %v15_v8 = vld [vmem:[%s879_s0 + $0x8] sm:$0xff] }
   0x3   :  { %v30_v6 = vld [vmem:[%s879_s0 + $0x80] sm:$0xff]  ;;  %v545_v7 = vpack.c.bf16 %v49_v4, %v48_v2  ;;  %493 = vmatprep.mubr.msk.f32.mxu0 %vm57_vm0, %v14_v5  ;;  %v31_v9 = vld [vmem:[%s879_s0 + $0x88] sm:$0xff]  ;;  %v16_v10 = vld [vmem:[%s879_s0 + $0x10] sm:$0xff] }
   0x4   :  { %517 = vmatprep.mubr.msk.f32.mxu1 %vm57_vm0, %v30_v6  ;;  %542 = vmatprep.subr.bf16.mxu0 %v541_v3  ;;  %v32_v11 = vld [vmem:[%s879_s0 + $0x90] sm:$0xff]  ;;  %v17_v12 = vld [vmem:[%s879_s0 + $0x18] sm:$0xff]  ;;  %v18_v14 = vld [vmem:[%s879_s0 + $0x20] sm:$0xff] }
   0x5   :  { %549 = vmatprep.subr.bf16.mxu1 %v541_v3  ;;  %544 = vmatpush3.bf16.msra.mxu0 %v541_v3  ;;  %v33_v13 = vld [vmem:[%s879_s0 + $0x98] sm:$0xff]  ;;  %v34_v15 = vld [vmem:[%s879_s0 + $0xa0] sm:$0xff]  ;;  %v19_v16 = vld [vmem:[%s879_s0 + $0x28] sm:$0xff] }
   0x6   :  { %551 = vmatpush3.bf16.msra.mxu1 %v541_v3  ;;  %546 = vmatprep.subr.bf16.mxu0 %v545_v7  ;;  %v35_v17 = vld [vmem:[%s879_s0 + $0xa8] sm:$0xff]  ;;  %v20_v18 = vld [vmem:[%s879_s0 + $0x30] sm:$0xff]  ;;  %v21_v20 = vld [vmem:[%s879_s0 + $0x38] sm:$0xff] }
   0x7   :  { %550 = vmatprep.subr.bf16.mxu1 %v545_v7  ;;  %v36_v19 = vld [vmem:[%s879_s0 + $0xb0] sm:$0xff]  ;;  %v37_v21 = vld [vmem:[%s879_s0 + $0xb8] sm:$0xff]  ;;  %v22_v22 = vld [vmem:[%s879_s0 + $0x40] sm:$0xff] }
   0x8   :  { %v38_v23 = vld [vmem:[%s879_s0 + $0xc0] sm:$0xff]  ;;  %v23_v24 = vld [vmem:[%s879_s0 + $0x48] sm:$0xff]  ;;  %v24_v26 = vld [vmem:[%s879_s0 + $0x50] sm:$0xff] }
   0x9   :  { %548 = vmatpush3.bf16.msra.mxu0 %v545_v7  ;;  %v39_v25 = vld [vmem:[%s879_s0 + $0xc8] sm:$0xff]  ;;  %v40_v27 = vld [vmem:[%s879_s0 + $0xd0] sm:$0xff]  ;;  %v25_v28 = vld [vmem:[%s879_s0 + $0x58] sm:$0xff] }
   0xa   :  { %552 = vmatpush3.bf16.msra.mxu1 %v545_v7  ;;  %v41_v29 = vld [vmem:[%s879_s0 + $0xd8] sm:$0xff]  ;;  %v26_v30 = vld [vmem:[%s879_s0 + $0x60] sm:$0xff]  ;;  %v27_v32 = vld [vmem:[%s879_s0 + $0x68] sm:$0xff] }
   0xb   :  { %v42_v31 = vld [vmem:[%s879_s0 + $0xe0] sm:$0xff]  ;;  %v43_v33 = vld [vmem:[%s879_s0 + $0xe8] sm:$0xff]  ;;  %v28_v34 = vld [vmem:[%s879_s0 + $0x70] sm:$0xff] }
   0xc   :  { %494 = vmatmul.mubr.msk.f32.vlgmr.msra.gmra.mrb[0].mxu0 %vm57_vm0, %v15_v8  ;;  %v44_v35 = vld [vmem:[%s879_s0 + $0xf0] sm:$0xff]  ;;  %v29_v36 = vld [vmem:[%s879_s0 + $0x78] sm:$0xff]  ;;  %v716_v38 = vld [vmem:[%s880_s2] ss:$0 sm:$0xff] }
   0xd   :  { %518 = vmatmul.mubr.msk.f32.vlgmr.msra.gmra.mrb[0].mxu1 %vm57_vm0, %v31_v9  ;;  %496 = vmatprep.mubr.msk.f32.mxu0 %vm57_vm0, %v16_v10  ;;  %v45_v37 = vld [vmem:[%s879_s0 + $0xf8] sm:$0xff] }
   0xe   :  { %520 = vmatprep.mubr.msk.f32.mxu1 %vm57_vm0, %v32_v11 }
  0x10   :  { %497 = vmatmul.mubr.msk.f32.gmra.mrb[2].mxu0 %vm57_vm0, %v17_v12 }
  0x11   :  { %521 = vmatmul.mubr.msk.f32.gmra.mrb[2].mxu1 %vm57_vm0, %v33_v13  ;;  %499 = vmatprep.mubr.msk.f32.mxu0 %vm57_vm0, %v18_v14 }
  0x12   :  { %523 = vmatprep.mubr.msk.f32.mxu1 %vm57_vm0, %v34_v15 }
  0x14   :  { %500 = vmatmul.mubr.msk.f32.gmra.mrb[4].mxu0 %vm57_vm0, %v19_v16 }
  0x15   :  { %524 = vmatmul.mubr.msk.f32.gmra.mrb[4].mxu1 %vm57_vm0, %v35_v17  ;;  %502 = vmatprep.mubr.msk.f32.mxu0 %vm57_vm0, %v20_v18 }
  0x16   :  { %526 = vmatprep.mubr.msk.f32.mxu1 %vm57_vm0, %v36_v19 }
  0x18   :  { %503 = vmatmul.mubr.msk.f32.gmra.mrb[6].mxu0 %vm57_vm0, %v21_v20 }
  0x19   :  { %527 = vmatmul.mubr.msk.f32.gmra.mrb[6].mxu1 %vm57_vm0, %v37_v21  ;;  %505 = vmatprep.mubr.msk.f32.mxu0 %vm57_vm0, %v22_v22 }
  0x1a   :  { %529 = vmatprep.mubr.msk.f32.mxu1 %vm57_vm0, %v38_v23 }
  0x1c   :  { %506 = vmatmul.mubr.msk.f32.gmra.mrb[8].mxu0 %vm57_vm0, %v23_v24 }
  0x1d   :  { %530 = vmatmul.mubr.msk.f32.gmra.mrb[8].mxu1 %vm57_vm0, %v39_v25  ;;  %508 = vmatprep.mubr.msk.f32.mxu0 %vm57_vm0, %v24_v26 }
  0x1e   :  { %532 = vmatprep.mubr.msk.f32.mxu1 %vm57_vm0, %v40_v27 }
  0x20   :  { %509 = vmatmul.mubr.msk.f32.gmra.mrb[10].mxu0 %vm57_vm0, %v25_v28 }
  0x21   :  { %533 = vmatmul.mubr.msk.f32.gmra.mrb[10].mxu1 %vm57_vm0, %v41_v29  ;;  %511 = vmatprep.mubr.msk.f32.mxu0 %vm57_vm0, %v26_v30 }
  0x22   :  { %535 = vmatprep.mubr.msk.f32.mxu1 %vm57_vm0, %v42_v31 }
  0x24   :  { %512 = vmatmul.mubr.msk.f32.gmra.mrb[12].mxu0 %vm57_vm0, %v27_v32 }
  0x25   :  { %536 = vmatmul.mubr.msk.f32.gmra.mrb[12].mxu1 %vm57_vm0, %v43_v33  ;;  %514 = vmatprep.mubr.msk.f32.mxu0 %vm57_vm0, %v28_v34 }
  0x26   :  { %538 = vmatprep.mubr.msk.f32.mxu1 %vm57_vm0, %v44_v35 }
  0x28   :  { %515 = vmatmul.mubr.msk.f32.gmra.mrb[14].mxu0 %vm57_vm0, %v29_v36 }
  0x29   :  { %539 = vmatmul.mubr.msk.f32.gmra.mrb[14].mxu1 %vm57_vm0, %v45_v37 }
  0xdf   :  { %v495_v39 = vpop.f32.mrb[0].mxu0 }
  0xe0   :  { %v519_v40 = vpop.f32.mrb[0].mxu1  ;;  %v226_v41 = vadd.f32 %v495_v39, %v716_v38  ;;  %v220_v43 = vpop.f32.mrb[1].mxu0 }
  0xe1   :  { %v306_v42 = vadd.f32 %v519_v40, %v716_v38  ;;  %v300_v44 = vpop.f32.mrb[1].mxu1  ;;  %v221_v45 = vadd.f32 %v716_v38, %v220_v43 }
  0xe2   :  { %v301_v46 = vadd.f32 %v716_v38, %v300_v44  ;;  %381 = vst.msk [vmem:[%s881_s3 + $0x8] sm:$0xff] %vm379_vm1, %v226_v41 }
  0xe3   :  { %397 = vst.msk [vmem:[%s881_s3 + $0x88] sm:$0xff] %vm379_vm1, %v306_v42  ;;  %380 = vst.msk [vmem:[%s881_s3] sm:$0xff] %vm379_vm1, %v221_v45  ;;  %v498_v47 = vpop.f32.mrb[2].mxu0 }
  0xe4   :  { %396 = vst.msk [vmem:[%s881_s3 + $0x80] sm:$0xff] %vm379_vm1, %v301_v46  ;;  %v522_v48 = vpop.f32.mrb[2].mxu1  ;;  %v236_v49 = vadd.f32 %v498_v47, %v716_v38  ;;  %v230_v51 = vpop.f32.mrb[3].mxu0 }
  0xe5   :  { %v316_v50 = vadd.f32 %v522_v48, %v716_v38  ;;  %v310_v52 = vpop.f32.mrb[3].mxu1  ;;  %v231_v53 = vadd.f32 %v716_v38, %v230_v51 }
  0xe6   :  { %v311_v54 = vadd.f32 %v716_v38, %v310_v52  ;;  %383 = vst.msk [vmem:[%s881_s3 + $0x18] sm:$0xff] %vm379_vm1, %v236_v49 }
  0xe7   :  { %399 = vst.msk [vmem:[%s881_s3 + $0x98] sm:$0xff] %vm379_vm1, %v316_v50  ;;  %382 = vst.msk [vmem:[%s881_s3 + $0x10] sm:$0xff] %vm379_vm1, %v231_v53  ;;  %v501_v55 = vpop.f32.mrb[4].mxu0 }
  0xe8   :  { %398 = vst.msk [vmem:[%s881_s3 + $0x90] sm:$0xff] %vm379_vm1, %v311_v54  ;;  %v525_v56 = vpop.f32.mrb[4].mxu1  ;;  %v246_v57 = vadd.f32 %v501_v55, %v716_v38  ;;  %v240_v59 = vpop.f32.mrb[5].mxu0 }
  0xe9   :  { %v326_v58 = vadd.f32 %v525_v56, %v716_v38  ;;  %v320_v60 = vpop.f32.mrb[5].mxu1  ;;  %v241_v61 = vadd.f32 %v716_v38, %v240_v59 }
  0xea   :  { %v321_v62 = vadd.f32 %v716_v38, %v320_v60  ;;  %385 = vst.msk [vmem:[%s881_s3 + $0x28] sm:$0xff] %vm379_vm1, %v246_v57 }
  0xeb   :  { %401 = vst.msk [vmem:[%s881_s3 + $0xa8] sm:$0xff] %vm379_vm1, %v326_v58  ;;  %384 = vst.msk [vmem:[%s881_s3 + $0x20] sm:$0xff] %vm379_vm1, %v241_v61  ;;  %v504_v63 = vpop.f32.mrb[6].mxu0 }
  0xec   :  { %400 = vst.msk [vmem:[%s881_s3 + $0xa0] sm:$0xff] %vm379_vm1, %v321_v62  ;;  %v528_v0 = vpop.f32.mrb[6].mxu1  ;;  %v256_v1 = vadd.f32 %v504_v63, %v716_v38  ;;  %v250_v3 = vpop.f32.mrb[7].mxu0 }
  0xed   :  { %v336_v2 = vadd.f32 %v528_v0, %v716_v38  ;;  %v330_v4 = vpop.f32.mrb[7].mxu1  ;;  %v251_v5 = vadd.f32 %v716_v38, %v250_v3 }
  0xee   :  { %v331_v6 = vadd.f32 %v716_v38, %v330_v4  ;;  %387 = vst.msk [vmem:[%s881_s3 + $0x38] sm:$0xff] %vm379_vm1, %v256_v1 }
  0xef   :  { %403 = vst.msk [vmem:[%s881_s3 + $0xb8] sm:$0xff] %vm379_vm1, %v336_v2  ;;  %386 = vst.msk [vmem:[%s881_s3 + $0x30] sm:$0xff] %vm379_vm1, %v251_v5  ;;  %v507_v7 = vpop.f32.mrb[8].mxu0 }
  0xf0   :  { %402 = vst.msk [vmem:[%s881_s3 + $0xb0] sm:$0xff] %vm379_vm1, %v331_v6  ;;  %v531_v8 = vpop.f32.mrb[8].mxu1  ;;  %v266_v9 = vadd.f32 %v507_v7, %v716_v38  ;;  %v260_v11 = vpop.f32.mrb[9].mxu0 }
  0xf1   :  { %v346_v10 = vadd.f32 %v531_v8, %v716_v38  ;;  %v340_v12 = vpop.f32.mrb[9].mxu1  ;;  %v261_v13 = vadd.f32 %v716_v38, %v260_v11 }
  0xf2   :  { %v341_v14 = vadd.f32 %v716_v38, %v340_v12  ;;  %389 = vst.msk [vmem:[%s881_s3 + $0x48] sm:$0xff] %vm379_vm1, %v266_v9 }
  0xf3   :  { %405 = vst.msk [vmem:[%s881_s3 + $0xc8] sm:$0xff] %vm379_vm1, %v346_v10  ;;  %388 = vst.msk [vmem:[%s881_s3 + $0x40] sm:$0xff] %vm379_vm1, %v261_v13  ;;  %v510_v15 = vpop.f32.mrb[10].mxu0 }
  0xf4   :  { %404 = vst.msk [vmem:[%s881_s3 + $0xc0] sm:$0xff] %vm379_vm1, %v341_v14  ;;  %v534_v16 = vpop.f32.mrb[10].mxu1  ;;  %v276_v17 = vadd.f32 %v510_v15, %v716_v38  ;;  %v270_v19 = vpop.f32.mrb[11].mxu0 }
  0xf5   :  { %v356_v18 = vadd.f32 %v534_v16, %v716_v38  ;;  %v350_v20 = vpop.f32.mrb[11].mxu1  ;;  %v271_v21 = vadd.f32 %v716_v38, %v270_v19 }
  0xf6   :  { %v351_v22 = vadd.f32 %v716_v38, %v350_v20  ;;  %391 = vst.msk [vmem:[%s881_s3 + $0x58] sm:$0xff] %vm379_vm1, %v276_v17 }
  0xf7   :  { %407 = vst.msk [vmem:[%s881_s3 + $0xd8] sm:$0xff] %vm379_vm1, %v356_v18  ;;  %390 = vst.msk [vmem:[%s881_s3 + $0x50] sm:$0xff] %vm379_vm1, %v271_v21  ;;  %v513_v23 = vpop.f32.mrb[12].mxu0 }
  0xf8   :  { %406 = vst.msk [vmem:[%s881_s3 + $0xd0] sm:$0xff] %vm379_vm1, %v351_v22  ;;  %v537_v24 = vpop.f32.mrb[12].mxu1  ;;  %v286_v25 = vadd.f32 %v513_v23, %v716_v38  ;;  %v280_v27 = vpop.f32.mrb[13].mxu0 }
  0xf9   :  { %v366_v26 = vadd.f32 %v537_v24, %v716_v38  ;;  %v360_v28 = vpop.f32.mrb[13].mxu1  ;;  %v281_v29 = vadd.f32 %v716_v38, %v280_v27 }
  0xfa   :  { %v361_v30 = vadd.f32 %v716_v38, %v360_v28  ;;  %393 = vst.msk [vmem:[%s881_s3 + $0x68] sm:$0xff] %vm379_vm1, %v286_v25 }
  0xfb   :  { %409 = vst.msk [vmem:[%s881_s3 + $0xe8] sm:$0xff] %vm379_vm1, %v366_v26  ;;  %392 = vst.msk [vmem:[%s881_s3 + $0x60] sm:$0xff] %vm379_vm1, %v281_v29  ;;  %v516_v31 = vpop.f32.mrb[14].mxu0 }
  0xfc   :  { %408 = vst.msk [vmem:[%s881_s3 + $0xe0] sm:$0xff] %vm379_vm1, %v361_v30  ;;  %v540_v32 = vpop.f32.mrb[14].mxu1  ;;  %v296_v33 = vadd.f32 %v516_v31, %v716_v38  ;;  %v290_v35 = vpop.f32.mrb[15].mxu0 }
  0xfd   :  { %v376_v34 = vadd.f32 %v540_v32, %v716_v38  ;;  %v370_v36 = vpop.f32.mrb[15].mxu1  ;;  %v291_v37 = vadd.f32 %v716_v38, %v290_v35 }
  0xfe   :  { %v371_v39 = vadd.f32 %v716_v38, %v370_v36  ;;  %395 = vst.msk [vmem:[%s881_s3 + $0x78] sm:$0xff] %vm379_vm1, %v296_v33 }
  0xff   :  { %411 = vst.msk [vmem:[%s881_s3 + $0xf8] sm:$0xff] %vm379_vm1, %v376_v34  ;;  %394 = vst.msk [vmem:[%s881_s3 + $0x70] sm:$0xff] %vm379_vm1, %v291_v37 }
 0x100   :  { %410 = vst.msk [vmem:[%s881_s3 + $0xf0] sm:$0xff] %vm379_vm1, %v371_v39 }

</bundles_post_ra>
